<compile_context>
chip_gen: v6e
topology: v6e:2x2x1
jax: 0.10.0
libtpu: 0.0.40
codegen_flags: <defaults>
</compile_context>

<pallas_src>
import jax
import jax.numpy as jnp
from jax import lax
from jax.experimental import pallas as pl
from jax.experimental.pallas import tpu as pltpu

LANE = 128


def _round_up(x, m):
    return ((x + m - 1) // m) * m


def _vmem_tile_bytes(shape, dtype):
    """Upper-bound VMEM footprint of one buffer, including lane/sublane padding."""
    it = jnp.dtype(dtype).itemsize
    sub = max(8, 32 // it)  # sublane packing width for sub-32-bit dtypes
    if len(shape) == 1:
        return _round_up(shape[0], LANE) * it
    lead = 1
    for d in shape[:-2]:
        lead *= d
    return lead * _round_up(shape[-2], sub) * _round_up(shape[-1], LANE) * it


def _pick_tm(n):
    """Bigger tiles amortize per-step overhead; keep several blocks for megacore."""
    if n >= 4 * 512:
        return 512
    if n >= 4 * 256:
        return 256
    return 128


def _onehot(ids, vocab, dtype):
    """(TM, 1) int32 ids -> (TM, vocab) one-hot matrix in `dtype` (VPU compare)."""
    iota = lax.broadcasted_iota(jnp.int32, (ids.shape[0], vocab), 1)
    return (ids == iota).astype(dtype)


def _emb_kernel_nomask(ids_ref, w_ref, out_ref):
    # out = onehot(ids) @ W,  W = A @ B precomputed once in the wrapper.
    p = _onehot(ids_ref[...], w_ref.shape[0], w_ref.dtype)
    out_ref[...] = jnp.dot(
        p, w_ref[...], preferred_element_type=jnp.float32
    ).astype(out_ref.dtype)


def _emb_kernel_mask(ids_ref, a_ref, mask_ref, b_ref, out_ref):
    # acts = (onehot(ids) @ A) * mask ;  out = acts @ B
    p = _onehot(ids_ref[...], a_ref.shape[0], a_ref.dtype)
    acts = jnp.dot(p, a_ref[...], preferred_element_type=jnp.float32)
    acts = acts * mask_ref[...]  # f32 multiply (v5e has no bf16 VPU)
    out_ref[...] = jnp.dot(
        acts.astype(b_ref.dtype), b_ref[...], preferred_element_type=jnp.float32
    ).astype(out_ref.dtype)


def embedding_component_forward(x, A, B, mask=None):
    """Pallas equivalent of EmbeddingComponent.forward (mask plays self.mask)."""
    batch, pos = x.shape
    vocab, C = A.shape
    C_b, E = B.shape
    assert C == C_b
    N = batch * pos
    out_dtype = A.dtype

    tm = _pick_tm(N)
    n_blocks = pl.cdiv(N, tm)
    N_pad = n_blocks * tm
    E_pad = _round_up(E, LANE)

    # Flatten ids; clamp to a valid row (PyTorch would raise on out-of-range ids;
    # here they are remapped deterministically) and pad to whole tiles. Padded
    # rows select row 0 and their outputs are dropped below.
    ids = jnp.clip(x.reshape(N, 1).astype(jnp.int32), 0, vocab - 1)
    if N_pad != N:
        ids = jnp.pad(ids, ((0, N_pad - N), (0, 0)))

    ids_spec = pl.BlockSpec((tm, 1), lambda i: (i, 0))
    out_spec = pl.BlockSpec((tm, E_pad), lambda i: (i, 0))

    if mask is None:
        # No-mask fast path: the op is algebraically one_hot(ids) @ (A @ B), so the
        # (C -> E) matmul is hoisted out of the kernel entirely.
        W = jnp.dot(A, B, preferred_element_type=jnp.float32).astype(out_dtype)
        if E_pad != E:
            W = jnp.pad(W, ((0, 0), (0, E_pad - E)))
        kernel = _emb_kernel_nomask
        in_specs = [ids_spec, pl.BlockSpec((vocab, E_pad), lambda i: (0, 0))]
        operands = (ids, W)
        bufs = [((vocab, E_pad), out_dtype), ((tm, 1), jnp.int32),
                ((tm, E_pad), out_dtype)]
    else:
        Bp = jnp.pad(B, ((0, 0), (0, E_pad - E))) if E_pad != E else B
        mask_flat = mask.reshape(N, C).astype(jnp.float32)
        if N_pad != N:
            mask_flat = jnp.pad(mask_flat, ((0, N_pad - N), (0, 0)))
        kernel = _emb_kernel_mask
        in_specs = [
            ids_spec,
            pl.BlockSpec((vocab, C), lambda i: (0, 0)),   # resident A
            pl.BlockSpec((tm, C), lambda i: (i, 0)),      # per-tile mask
            pl.BlockSpec((C, E_pad), lambda i: (0, 0)),   # resident B
        ]
        operands = (ids, A, mask_flat, Bp)
        bufs = [((vocab, C), A.dtype), ((C, E_pad), B.dtype),
                ((tm, 1), jnp.int32), ((tm, C), jnp.float32),
                ((tm, E_pad), out_dtype)]

    # Lane/sublane-padding-aware VMEM budget (default double-buffering on every
    # operand). Only raise the scoped limit when needed, capped by the chip's
    # physical VMEM so v7x's 64 MiB is never exceeded.
    est = 2 * sum(_vmem_tile_bytes(s, d) for s, d in bufs)
    cp_kwargs = dict(dimension_semantics=("parallel",))
    if est > 16 * 1024 * 1024:
        try:
            cap = int(pltpu.get_tpu_info().vmem_capacity_bytes)
        except Exception:
            cap = 64 * 1024 * 1024
        cp_kwargs["vmem_limit_bytes"] = int(min(est + (4 << 20), int(cap * 0.9)))

    out_flat = pl.pallas_call(
        kernel,
        out_shape=jax.ShapeDtypeStruct((N_pad, E_pad), out_dtype),
        grid=(n_blocks,),
        in_specs=in_specs,
        out_specs=out_spec,
        compiler_params=pltpu.CompilerParams(**cp_kwargs),
    )(*operands)

    if N_pad != N or E_pad != E:
        out_flat = out_flat[:N, :E]
    return out_flat.reshape(batch, pos, E)


if __name__ == "__main__":
    key = jax.random.PRNGKey(0)
    vocab_size, C, embedding_dim = 32, 16, 64
    batch, pos = 2, 8

    k1, k2, k3, k4 = jax.random.split(key, 4)
    # Deterministic init mimicking init_param_(fan_val=...) scaling (std ~ 1/sqrt(fan)).
    A = jax.random.normal(k1, (vocab_size, C), jnp.float32) / jnp.sqrt(
        jnp.float32(embedding_dim)
    )
    Bm = jax.random.normal(k2, (C, embedding_dim), jnp.float32) / jnp.sqrt(
        jnp.float32(C)
    )
    x = jax.random.randint(k3, (batch, pos), 0, vocab_size, dtype=jnp.int32)
    mask = jax.random.uniform(k4, (batch, pos, C), dtype=jnp.float32)

    # mask is None path (module default)
    out = embedding_component_forward(x, A, Bm)
    out = jax.block_until_ready(out)
    ref = jnp.take(A, x, axis=0) @ Bm
    assert out.shape == (batch, pos, embedding_dim)
    assert jnp.allclose(out, ref, atol=1e-5, rtol=1e-5), "mismatch (no mask)"

    # mask set (self.mask attribute) path
    out_m = embedding_component_forward(x, A, Bm, mask=mask)
    out_m = jax.block_until_ready(out_m)
    ref_m = (jnp.take(A, x, axis=0) * mask) @ Bm
    assert jnp.allclose(out_m, ref_m, atol=1e-5, rtol=1e-5), "mismatch (mask)"

    print("KERNEL_OK")
</pallas_src>

<mosaic_0001>
module attributes {stable_mosaic.version = 11 : i64} {
  func.func @_emb_kernel_nomask(%arg0: i32, %arg1: memref<128x1xi32, #tpu.memory_space<vmem>>, %arg2: memref<32x128xf32, #tpu.memory_space<vmem>>, %arg3: memref<128x128xf32, #tpu.memory_space<vmem>>) attributes {dimension_semantics = [#tpu.dimension_semantics<parallel>], iteration_bounds = array<i64: 1>, scalar_prefetch = 0 : i64, scratch_operands = 0 : i64, tpu.core_type = #tpu.core_type<tc>, window_params = [{transform_indices = @transform_0, window_bounds = array<i64: 128, 1>}, {pipeline_mode = #tpu.pipeline_mode<synchronous>, transform_indices = @transform_1, window_bounds = array<i64: 32, 128>}, {transform_indices = @transform_2, window_bounds = array<i64: 128, 128>}]} {
    %c0 = arith.constant 0 : index
    %c0_0 = arith.constant 0 : index
    %0 = vector.load %arg1[%c0, %c0_0] : memref<128x1xi32, #tpu.memory_space<vmem>>, vector<128x1xi32>
    %1 = tpu.iota {dimensions = array<i32: 1>} : vector<128x32xi32>
    %2 = vector.broadcast %0 : vector<128x1xi32> to vector<128x32xi32>
    %3 = arith.cmpi eq, %2, %1 : vector<128x32xi32>
    %4 = arith.extui %3 : vector<128x32xi1> to vector<128x32xi32>
    %5 = arith.sitofp %4 : vector<128x32xi32> to vector<128x32xf32>
    %c0_1 = arith.constant 0 : index
    %c0_2 = arith.constant 0 : index
    %6 = vector.load %arg2[%c0_1, %c0_2] : memref<32x128xf32, #tpu.memory_space<vmem>>, vector<32x128xf32>
    %cst = arith.constant dense<0.000000e+00> : vector<128x128xf32>
    %7 = tpu.matmul %5, %6, %cst {dimension_numbers = #tpu.dot_dimension_numbers<[1], [0], [0], [1], [0, 0, 1, 1], [], []>} : vector<128x32xf32>, vector<32x128xf32>, vector<128x128xf32> -> vector<128x128xf32>
    %c0_3 = arith.constant 0 : index
    %c0_4 = arith.constant 0 : index
    %8 = vector.load %arg3[%c0_3, %c0_4] : memref<128x128xf32, #tpu.memory_space<vmem>>, vector<128x128xf32>
    tpu.vector_store %arg3[%c0_3, %c0_4], %7 {strides = array<i32>} : memref<128x128xf32, #tpu.memory_space<vmem>>, vector<128x128xf32>,
    return
  }
  func.func @transform_0(%arg0: i32) -> (i32, i32) {
    %c0_i32 = arith.constant 0 : i32
    %c0_i32_0 = arith.constant 0 : i32
    return %arg0, %c0_i32 : i32, i32
  }
  func.func @transform_1(%arg0: i32) -> (i32, i32) {
    %c0_i32 = arith.constant 0 : i32
    %c0_i32_0 = arith.constant 0 : i32
    %c0_i32_1 = arith.constant 0 : i32
    return %c0_i32, %c0_i32_0 : i32, i32
  }
  func.func @transform_2(%arg0: i32) -> (i32, i32) {
    %c0_i32 = arith.constant 0 : i32
    %c0_i32_0 = arith.constant 0 : i32
    return %arg0, %c0_i32 : i32, i32
  }
}

</mosaic_0001>

<bundles_post_ra>
// kernel: tpu_custom_call.1
= control target key start
LH: loop header
LB: loop body
LE: loop exit
PB: predicated region body
PF: predicated region fallthrough
CT: control target
= control target key end

     0   :  { %v477_v2 = vmov 0   ;;  %s594_s0 = inlined_call_operand.vmem [shape: s32[128,1], index: 0, kind: input, shape index: {}]   ;;  %s595_s1 = inlined_call_operand.vmem [shape: f32[32,128], index: 1, kind: input, shape index: {}]   ;;  %s596_s2 = inlined_call_operand.hbm [shape: f32[128,128], index: 2, kind: output, shape index: {}]  }
   0x1   :  { %v13_v0 = vld [vmem:[%s594_s0 + $0x8] sm:$0xff]  ;;  %v12_v1 = vld [vmem:[%s594_s0] sm:$0xff]  ;;  %454 = vset.pattern.permute.xlu1 %v477_v2  ;;  %453 = vset.pattern.permute.xlu0 %v477_v2  ;;  %v129_v5 = vld [vmem:[%s595_s1 + $0x18] sm:$0xff] }
   0x2   :  { %34 = vperm.xlu1 %454, %v13_v0   ;;  %31 = vperm.xlu0 %453, %v12_v1   ;;  %v21_v3 = vld [vmem:[%s594_s0 + $0x48] sm:$0xff]  ;;  %v20_v4 = vld [vmem:[%s594_s0 + $0x40] sm:$0xff]  ;;  %v128_v6 = vld [vmem:[%s595_s1 + $0x10] sm:$0xff] }
   0x6   :  { %58 = vperm.xlu1 %454, %v21_v3   ;;  %55 = vperm.xlu0 %453, %v20_v4  }
   0x7   :  { %7 = vsyncpa [#allocation3], 0  ;;  %v22_v7 = vld [vmem:[%s594_s0 + $0x50] sm:$0xff]  ;;  %408 = vmatprep.subr.mxu0 %v129_v5  ;;  %440 = vmatprep.subr.mxu1 %v129_v5  ;;  %v127_v9 = vld [vmem:[%s595_s1 + $0x8] sm:$0xff]  ;;  %v28_v21 = vlaneseq  ;;  %vm130_vm0 = vcmask 261120   ;;  %v478_v25 = vmov 0.0  }
   0x8   :  { %v14_v8 = vld [vmem:[%s594_s0 + $0x10] sm:$0xff]  ;;  %409 = vmatpush3.msra.mxu0 %v129_v5  ;;  %444 = vmatpush3.msra.mxu1 %v129_v5  ;;  %v23_v10 = vld [vmem:[%s594_s0 + $0x58] sm:$0xff]  ;;  %v126_v12 = vld [vmem:[%s595_s1] sm:$0xff] }
   0x9   :  { %410 = vmatprep.subr.mxu0 %v128_v6  ;;  %441 = vmatprep.subr.mxu1 %v128_v6  ;;  %v15_v11 = vld [vmem:[%s594_s0 + $0x18] sm:$0xff]  ;;  %v24_v13 = vld [vmem:[%s594_s0 + $0x60] sm:$0xff]  ;;  %v25_v15 = vld [vmem:[%s594_s0 + $0x68] sm:$0xff]  ;;  %v557_v22 = vand.u32 127, %v28_v21 }
   0xa   :  { %61 = vperm.xlu1 %454, %v22_v7   ;;  %37 = vperm.xlu0 %453, %v14_v8   ;;  %v16_v14 = vld [vmem:[%s594_s0 + $0x20] sm:$0xff]  ;;  %v17_v16 = vld [vmem:[%s594_s0 + $0x28] sm:$0xff]  ;;  %v26_v17 = vld [vmem:[%s594_s0 + $0x70] sm:$0xff] }
   0xb   :  { %411 = vmatpush3.msra.mxu0 %v128_v6  ;;  %445 = vmatpush3.msra.mxu1 %v128_v6  ;;  %v18_v18 = vld [vmem:[%s594_s0 + $0x30] sm:$0xff]  ;;  %v27_v19 = vld [vmem:[%s594_s0 + $0x78] sm:$0xff] }
   0xc   :  { %412 = vmatprep.subr.mxu0 %v127_v9  ;;  %442 = vmatprep.subr.mxu1 %v127_v9  ;;  %v19_v20 = vld [vmem:[%s594_s0 + $0x38] sm:$0xff]  ;;  %s479_s0 = smov [#allocation2]  }
   0xd   :  { %413 = vmatpush3.msra.mxu0 %v127_v9  ;;  %446 = vmatpush3.msra.mxu1 %v127_v9  ;;  %s345_s20 = sshll.u32 %s479_s0, 4  ;;  %s346_s20 = int_to_ptr.vmem [resolvable:$true] %s345_s20 }
   0xe   :  { %64 = vperm.xlu1 %454, %v23_v10   ;;  %40 = vperm.xlu0 %453, %v15_v11   ;;  %s455_s21 = scalar_lea.vmem %s346_s20, 2048  ;;  %p460_p1 = scmp.lt.s32.totalorder %s346_s20, %s346_s20 }
   0xf   :  { %414 = vmatprep.subr.mxu0 %v126_v12  ;;  %443 = vmatprep.subr.mxu1 %v126_v12  ;;  %p456_p0 = scmp.ne.s32.totalorder %s346_s20, %s455_s21  ;;  %p461_p2 = scmp.lt.s32.totalorder %s455_s21, %s455_s21 }
  0x10   :  { %415 = vmatpush3.msra.mxu0 %v126_v12  ;;  %447 = vmatpush3.msra.mxu1 %v126_v12 }
  0x11   :  { %p462_p3 = por %p461_p2, %p460_p1 }
  0x12   :  { %67 = vperm.xlu1 %454, %v24_v13   ;;  %43 = vperm.xlu0 %453, %v16_v14  }
  0x13   :  { %p463_p4 = pnand %p462_p3, %p456_p0 }
  0x16   :  { %70 = vperm.xlu1 %454, %v25_v15   ;;  %46 = vperm.xlu0 %453, %v17_v16  }
  0x1a   :  { %73 = vperm.xlu1 %454, %v26_v17   ;;  %49 = vperm.xlu0 %453, %v18_v18  }
  0x1e   :  { %76 = vperm.xlu1 %454, %v27_v19   ;;  %52 = vperm.xlu0 %453, %v19_v20  }
  0x7d   :  { %v35_v23 = vpop.permute.xlu1 %34  ;;  %v32_v24 = vpop.permute.xlu0 %31 }
  0x7e   :  { %vm79_vm1 = vcmp.eq.s32.totalorder %v35_v23, %v557_v22  ;;  %vm78_vm2 = vcmp.eq.s32.totalorder %v32_v24, %v557_v22 }
  0x7f   :  { %v357_v26 = vsel %vm79_vm1, 1.0, %v478_v25  ;;  %v356_v27 = vsel %vm78_vm2, 1.0, %v478_v25 }
  0x80   :  { %416 = vmatprep.mubr.msk.f32.mxu0 %vm130_vm0, %v356_v27 }
  0x81   :  { %v59_v28 = vpop.permute.xlu1 %58  ;;  %417 = vmatmul.mubr.msk.f32.vlgmr.msra.gmra.mxu0 %vm130_vm0, %v357_v26  ;;  %v56_v29 = vpop.permute.xlu0 %55 }
  0x82   :  { %vm87_vm3 = vcmp.eq.s32.totalorder %v59_v28, %v557_v22  ;;  %vm86_vm4 = vcmp.eq.s32.totalorder %v56_v29, %v557_v22 }
  0x83   :  { %v365_v30 = vsel %vm87_vm3, 1.0, %v478_v25  ;;  %v364_v31 = vsel %vm86_vm4, 1.0, %v478_v25 }
  0x84   :  { %428 = vmatprep.mubr.msk.f32.mxu1 %vm130_vm0, %v364_v31 }
  0x85   :  { %v62_v32 = vpop.permute.xlu1 %61  ;;  %429 = vmatmul.mubr.msk.f32.vlgmr.msra.gmra.mxu1 %vm130_vm0, %v365_v30  ;;  %v38_v33 = vpop.permute.xlu0 %37 }
  0x86   :  { %vm88_vm5 = vcmp.eq.s32.totalorder %v62_v32, %v557_v22  ;;  %vm80_vm6 = vcmp.eq.s32.totalorder %v38_v33, %v557_v22 }
  0x87   :  { %v366_v34 = vsel %vm88_vm5, 1.0, %v478_v25  ;;  %v358_v35 = vsel %vm80_vm6, 1.0, %v478_v25 }
  0x88   :  { %419 = vmatprep.mubr.msk.f32.mxu0 %vm130_vm0, %v358_v35  ;;  %431 = vmatprep.mubr.msk.f32.mxu1 %vm130_vm0, %v366_v34 }
  0x89   :  { %v65_v36 = vpop.permute.xlu1 %64  ;;  %v41_v37 = vpop.permute.xlu0 %40 }
  0x8a   :  { %vm89_vm7 = vcmp.eq.s32.totalorder %v65_v36, %v557_v22  ;;  %vm81_vm8 = vcmp.eq.s32.totalorder %v41_v37, %v557_v22 }
  0x8b   :  { %v367_v38 = vsel %vm89_vm7, 1.0, %v478_v25  ;;  %v359_v39 = vsel %vm81_vm8, 1.0, %v478_v25 }
  0x8c   :  { %420 = vmatmul.mubr.msk.f32.gmra.mxu0 %vm130_vm0, %v359_v39  ;;  %432 = vmatmul.mubr.msk.f32.gmra.mxu1 %vm130_vm0, %v367_v38 }
  0x8d   :  { %v68_v40 = vpop.permute.xlu1 %67  ;;  %v44_v41 = vpop.permute.xlu0 %43 }
  0x8e   :  { %vm90_vm9 = vcmp.eq.s32.totalorder %v68_v40, %v557_v22  ;;  %vm82_vm10 = vcmp.eq.s32.totalorder %v44_v41, %v557_v22 }
  0x8f   :  { %v368_v42 = vsel %vm90_vm9, 1.0, %v478_v25  ;;  %v360_v43 = vsel %vm82_vm10, 1.0, %v478_v25 }
  0x90   :  { %422 = vmatprep.mubr.msk.f32.mxu0 %vm130_vm0, %v360_v43  ;;  %434 = vmatprep.mubr.msk.f32.mxu1 %vm130_vm0, %v368_v42 }
  0x91   :  { %v71_v44 = vpop.permute.xlu1 %70  ;;  %v47_v45 = vpop.permute.xlu0 %46 }
  0x92   :  { %vm91_vm11 = vcmp.eq.s32.totalorder %v71_v44, %v557_v22  ;;  %vm83_vm12 = vcmp.eq.s32.totalorder %v47_v45, %v557_v22 }
  0x93   :  { %v369_v46 = vsel %vm91_vm11, 1.0, %v478_v25  ;;  %v361_v47 = vsel %vm83_vm12, 1.0, %v478_v25 }
  0x94   :  { %423 = vmatmul.mubr.msk.f32.gmra.mxu0 %vm130_vm0, %v361_v47  ;;  %435 = vmatmul.mubr.msk.f32.gmra.mxu1 %vm130_vm0, %v369_v46 }
  0x95   :  { %v74_v48 = vpop.permute.xlu1 %73  ;;  %v50_v49 = vpop.permute.xlu0 %49 }
  0x96   :  { %vm92_vm13 = vcmp.eq.s32.totalorder %v74_v48, %v557_v22  ;;  %vm84_vm14 = vcmp.eq.s32.totalorder %v50_v49, %v557_v22 }
  0x97   :  { %v370_v50 = vsel %vm92_vm13, 1.0, %v478_v25  ;;  %v362_v51 = vsel %vm84_vm14, 1.0, %v478_v25 }
  0x98   :  { %425 = vmatprep.mubr.msk.f32.mxu0 %vm130_vm0, %v362_v51  ;;  %437 = vmatprep.mubr.msk.f32.mxu1 %vm130_vm0, %v370_v50 }
  0x99   :  { %v77_v52 = vpop.permute.xlu1 %76  ;;  %v53_v53 = vpop.permute.xlu0 %52 }
  0x9a   :  { %vm93_vm15 = vcmp.eq.s32.totalorder %v77_v52, %v557_v22  ;;  %vm85_vm1 = vcmp.eq.s32.totalorder %v53_v53, %v557_v22 }
  0x9b   :  { %v371_v54 = vsel %vm93_vm15, 1.0, %v478_v25  ;;  %v363_v55 = vsel %vm85_vm1, 1.0, %v478_v25 }
  0x9c   :  { %426 = vmatmul.mubr.msk.f32.gmra.mxu0 %vm130_vm0, %v363_v55  ;;  %438 = vmatmul.mubr.msk.f32.gmra.mxu1 %vm130_vm0, %v371_v54 }
 0x141   :  { %v418_v56 = vpop.f32.mrf.mxu0 }
 0x142   :  { %325 = vst [vmem:[#allocation2 + $0x8] sm:$0xff] %v418_v56 }
 0x143   :  { %v245_v57 = vpop.f32.mrf.mxu0 }
 0x144   :  { %324 = vst [vmem:[#allocation2] sm:$0xff] %v245_v57 }
 0x145   :  { %v430_v58 = vpop.f32.mrf.mxu1 }
 0x146   :  { %333 = vst [vmem:[#allocation2 + $0x48] sm:$0xff] %v430_v58 }
 0x147   :  { %v285_v59 = vpop.f32.mrf.mxu1 }
 0x148   :  { %332 = vst [vmem:[#allocation2 + $0x40] sm:$0xff] %v285_v59 }
 0x14c   :  { %v421_v60 = vpop.f32.mrf.mxu0  ;;  %v433_v61 = vpop.f32.mrf.mxu1 }
 0x14d   :  { %327 = vst [vmem:[#allocation2 + $0x18] sm:$0xff] %v421_v60  ;;  %335 = vst [vmem:[#allocation2 + $0x58] sm:$0xff] %v433_v61 }
 0x14e   :  { %v255_v62 = vpop.f32.mrf.mxu0  ;;  %v295_v63 = vpop.f32.mrf.mxu1 }
 0x14f   :  { %326 = vst [vmem:[#allocation2 + $0x10] sm:$0xff] %v255_v62  ;;  %334 = vst [vmem:[#allocation2 + $0x50] sm:$0xff] %v295_v63 }
 0x154   :  { %v424_v0 = vpop.f32.mrf.mxu0  ;;  %v436_v1 = vpop.f32.mrf.mxu1 }
 0x155   :  { %329 = vst [vmem:[#allocation2 + $0x28] sm:$0xff] %v424_v0  ;;  %337 = vst [vmem:[#allocation2 + $0x68] sm:$0xff] %v436_v1 }
 0x156   :  { %v265_v2 = vpop.f32.mrf.mxu0  ;;  %v305_v3 = vpop.f32.mrf.mxu1 }
 0x157   :  { %328 = vst [vmem:[#allocation2 + $0x20] sm:$0xff] %v265_v2  ;;  %336 = vst [vmem:[#allocation2 + $0x60] sm:$0xff] %v305_v3 }
 0x15c   :  { %v427_v4 = vpop.f32.mrf.mxu0  ;;  %v439_v5 = vpop.f32.mrf.mxu1 }
 0x15d   :  { %331 = vst [vmem:[#allocation2 + $0x38] sm:$0xff] %v427_v4  ;;  %339 = vst [vmem:[#allocation2 + $0x78] sm:$0xff] %v439_v5 }
 0x15e   :  { %v275_v6 = vpop.f32.mrf.mxu0  ;;  %v315_v7 = vpop.f32.mrf.mxu1 }
 0x15f   :  { %330 = vst [vmem:[#allocation2 + $0x30] sm:$0xff] %v275_v6  ;;  %338 = vst [vmem:[#allocation2 + $0x70] sm:$0xff] %v315_v7 }
 0x160   :  { %466 = shalt.err (!%p463_p4)
}
 0x161   :  { %s480_s22 = smov 128   ;;  %s481_s23 = smov 8  }
 0x162   :  { %351 = dma.vmem_to_hbm [thread:$0]  %s346_s20, 2048, %s596_s2, [#allocation3], %s480_s22, %s480_s22, %s481_s23  }
 0x163   :  { %475 = dma.done.wait [#allocation3], 2048  }
 0x164   :  { %476 = vsyncadd [#allocation3], 4294965248 }
 0x165   :  { %355 = vsyncpa [#allocation3], 1 }

</bundles_post_ra>
